<compile_context>
chip_gen: v5e
topology: v5e:2x2
jax: 0.10.0
libtpu: 0.0.40
codegen_flags: <defaults>
</compile_context>

<pallas_src>
import jax
import jax.numpy as jnp
from jax.experimental import pallas as pl
from jax.experimental.pallas import tpu as pltpu


def _round_up(n, m):
    return ((n + m - 1) // m) * m


def _vmem_budget_bytes():
    """Generation-aware usable VMEM budget (v5e/v6e: 128 MiB, v7x: 64 MiB)."""
    try:
        cap = pltpu.get_tpu_info().vmem_capacity_bytes
    except Exception:
        cap = 64 * 1024 * 1024  # conservative (v7x) if the query is unavailable
    return min(int(cap * 3 // 4), 112 * 1024 * 1024)


def _bspec(shape, index_map, buffers=None):
    """BlockSpec, optionally single/multi-buffered (invariant blocks -> 1)."""
    if buffers is not None and hasattr(pl, "Buffered"):
        try:
            return pl.BlockSpec(shape, index_map, pipeline_mode=pl.Buffered(buffers))
        except TypeError:
            pass
    return pl.BlockSpec(shape, index_map)


def _mlp_kernel(x_ref, w1_ref, b1_ref, w2_ref, b2_ref, o_ref, acc_ref):
    hj = pl.program_id(1)

    @pl.when(hj == 0)
    def _():
        acc_ref[...] = jnp.zeros_like(acc_ref)

    # In-kernel cast of x to the compute dtype (no extra wrapper HBM pass).
    lhs = x_ref[...].astype(w1_ref.dtype)
    # linear1 tile: MXU matmul with f32 accumulation, bias + ReLU in f32 (VPU).
    h = jnp.dot(lhs, w1_ref[...], preferred_element_type=jnp.float32)
    h = jnp.maximum(h + b1_ref[...], 0.0)
    # Dropout(0.5) == identity in eval mode.
    # linear2 tile: accumulate into the f32 scratch across hidden-dim tiles.
    acc_ref[...] += jnp.dot(h.astype(w2_ref.dtype), w2_ref[...],
                            preferred_element_type=jnp.float32)

    @pl.when(hj == pl.num_programs(1) - 1)
    def _():
        o_ref[...] = (acc_ref[...] + b2_ref[...]).astype(o_ref.dtype)


def prepare_params(w1, b1, w2, b2, *, compute_dtype=jnp.bfloat16):
    """Pad H/C to 128-multiples and cast the weights ONCE (hoisted out of forward).

    K (reduction dim of the first matmul) is deliberately not padded: a block
    whose last dim equals the full array dim satisfies the (8,128) rule and the
    MXU simply runs underfilled.  Padded columns/rows are zeros, so the math is
    exact; padded logit columns are sliced off in the wrapper.
    """
    K, H = w1.shape
    C = w2.shape[1]
    Hp = _round_up(H, 128)
    Cp = _round_up(C, 128)
    w1p = jnp.zeros((K, Hp), compute_dtype).at[:, :H].set(w1.astype(compute_dtype))
    w2p = jnp.zeros((Hp, Cp), compute_dtype).at[:H, :C].set(w2.astype(compute_dtype))
    # Biases stay f32 (added to the f32 MXU accumulator on the VPU).
    b1p = jnp.zeros((1, Hp), jnp.float32).at[:, :H].set(
        b1.reshape(1, -1).astype(jnp.float32))
    b2p = jnp.zeros((1, Cp), jnp.float32).at[:, :C].set(
        b2.reshape(1, -1).astype(jnp.float32))
    return dict(w1=w1p, b1=b1p, w2=w2p, b2=b2p, K=K, H=H, C=C, Hp=Hp, Cp=Cp)


def pure_classifier_forward(x, params, *, block_m=None, block_h=None,
                            out_dtype=None):
    """x: (B, in_features); params: output of prepare_params()."""
    B, K = x.shape
    assert K == params["K"], "in_features mismatch with prepared params"
    Hp, Cp, C = params["Hp"], params["Cp"], params["C"]
    w1p, b1p, w2p, b2p = params["w1"], params["b1"], params["w2"], params["b2"]

    if out_dtype is None:
        out_dtype = x.dtype
    compute_itm = jnp.dtype(w1p.dtype).itemsize
    x_itm = jnp.dtype(x.dtype).itemsize
    out_itm = jnp.dtype(out_dtype).itemsize

    budget = _vmem_budget_bytes()

    # --- batch tiling: no padding; Pallas masks the partial last block -------
    if block_m is None:
        if B <= 16:
            block_m = B  # single full-extent tile (satisfies the (8,128) rule)
        else:
            # >=2 tiles so the "parallel" batch axis can shard across v7x's two
            # TensorCores; 16-row alignment (bf16 sublane packing).
            block_m = min(1024, _round_up(pl.cdiv(B, 2), 16))
            row_bytes = 2 * K * x_itm + 2 * Cp * out_itm + Cp * 4
            max_rows = max(16, ((budget // 2) // max(row_bytes, 1)) // 16 * 16)
            block_m = min(block_m, max_rows)
    num_m = pl.cdiv(B, block_m)

    # --- hidden-dim tiling: only when the weight set does not fit VMEM -------
    fixed = (2 * block_m * K * x_itm          # x tile (double-buffered)
             + 2 * block_m * Cp * out_itm     # out tile (double-buffered)
             + block_m * Cp * 4               # f32 accumulator scratch
             + Cp * 4)                        # b2
    def _wbytes(bh, nbuf):
        return nbuf * ((K * bh + bh * Cp) * compute_itm + bh * 4)

    if block_h is None:
        if fixed + _wbytes(Hp, 1) <= budget:
            block_h = Hp                      # whole weight set VMEM-resident
        else:
            block_h = 128                     # best-effort floor
            for bh in range(128, Hp + 1, 128):
                if Hp % bh == 0 and fixed + _wbytes(bh, 2) <= budget:
                    block_h = bh
    assert Hp % block_h == 0, "block_h must evenly divide the padded hidden dim"
    num_h = Hp // block_h
    resident = (num_h == 1)
    wbuf = 1 if resident else None            # invariant blocks -> single buffer

    in_specs = [
        pl.BlockSpec((block_m, K), lambda i, j: (i, 0)),           # x
        _bspec((K, block_h), lambda i, j: (0, j), wbuf),           # w1
        _bspec((1, block_h), lambda i, j: (0, j), wbuf),           # b1
        _bspec((block_h, Cp), lambda i, j: (j, 0), wbuf),          # w2
        _bspec((1, Cp), lambda i, j: (0, 0), 1),                   # b2 (const)
    ]
    out_specs = pl.BlockSpec((block_m, Cp), lambda i, j: (i, 0))

    cost = pl.CostEstimate(
        flops=2 * B * (K * Hp + Hp * Cp),
        transcendentals=0,
        bytes_accessed=(B * K * x_itm
                        + (K * Hp + Hp * Cp) * compute_itm
                        + (Hp + Cp) * 4
                        + B * Cp * out_itm),
    )

    out = pl.pallas_call(
        _mlp_kernel,
        out_shape=jax.ShapeDtypeStruct((B, Cp), out_dtype),
        grid_spec=pltpu.PrefetchScalarGridSpec(
            num_scalar_prefetch=0,
            grid=(num_m, num_h),
            in_specs=in_specs,
            out_specs=out_specs,
            scratch_shapes=[pltpu.VMEM((block_m, Cp), jnp.float32)],
        ),
        compiler_params=pltpu.CompilerParams(
            # Independent batch tiles -> shard across TCs; hidden dim is a
            # reduction -> "arbitrary" and innermost.
            dimension_semantics=("parallel", "arbitrary"),
            vmem_limit_bytes=budget,
        ),
        cost_estimate=cost,
    )(x, w1p, b1p, w2p, b2p)

    # Only the padded logit columns are sliced off (no batch padding any more).
    return out[:, :C]


def init_params(key, in_features, out_features, num_classes, dtype=jnp.float32):
    """Deterministic init mimicking nn.Linear's uniform(-1/sqrt(fan_in), ...)."""
    k1, k2, k3, k4 = jax.random.split(key, 4)
    lim1 = 1.0 / jnp.sqrt(in_features)
    lim2 = 1.0 / jnp.sqrt(out_features)
    w1 = jax.random.uniform(k1, (in_features, out_features), dtype, -lim1, lim1)
    b1 = jax.random.uniform(k2, (1, out_features), dtype, -lim1, lim1)
    w2 = jax.random.uniform(k3, (out_features, num_classes), dtype, -lim2, lim2)
    b2 = jax.random.uniform(k4, (1, num_classes), dtype, -lim2, lim2)
    return w1, b1, w2, b2


if __name__ == "__main__":
    # Small shapes consistent with the module: x is (batch, in_features).
    batch, in_features, out_features, num_classes = 8, 32, 64, 10

    key = jax.random.PRNGKey(0)
    kx, kp = jax.random.split(key)
    x = jax.random.normal(kx, (batch, in_features), dtype=jnp.float32)
    w1, b1, w2, b2 = init_params(kp, in_features, out_features, num_classes)

    # Pure-JAX reference (eval-mode PureClassifier).
    ref = jnp.maximum(x @ w1 + b1, 0.0) @ w2 + b2

    # Weight padding / casting is done ONCE (hoisted out of the forward).
    params_f32 = prepare_params(w1, b1, w2, b2, compute_dtype=jnp.float32)
    params_bf16 = prepare_params(w1, b1, w2, b2, compute_dtype=jnp.bfloat16)

    # 1) f32 compute path (resident-weight fast path) — exact-semantics check.
    out_f32 = jax.block_until_ready(pure_classifier_forward(x, params_f32))
    assert out_f32.shape == (batch, num_classes)
    assert jnp.allclose(out_f32, ref, atol=1e-5, rtol=1e-5)

    # 2) bf16 weights (MXU-native, default), f32 accumulation — relaxed check.
    out_bf16 = jax.block_until_ready(pure_classifier_forward(x, params_bf16))
    assert out_bf16.shape == (batch, num_classes)
    assert jnp.allclose(out_bf16, ref, atol=2e-2, rtol=2e-2)

    # 3) Exercise the H-tiled accumulator fallback (block_h < Hp) at small scale.
    out_features2, num_classes2 = 256, 10
    w1b, b1b, w2b, b2b = init_params(jax.random.PRNGKey(1), in_features,
                                     out_features2, num_classes2)
    ref2 = jnp.maximum(x @ w1b + b1b, 0.0) @ w2b + b2b
    params2 = prepare_params(w1b, b1b, w2b, b2b, compute_dtype=jnp.float32)
    out2 = jax.block_until_ready(
        pure_classifier_forward(x, params2, block_h=128))
    assert out2.shape == (batch, num_classes2)
    assert jnp.allclose(out2, ref2, atol=1e-4, rtol=1e-4)

    print("KERNEL_OK")
</pallas_src>

<mosaic_0001>
module attributes {stable_mosaic.version = 11 : i64} {
  func.func @_mlp_kernel(%arg0: i32, %arg1: i32, %arg2: memref<8x32xf32, #tpu.memory_space<vmem>>, %arg3: memref<32x128xf32, #tpu.memory_space<vmem>>, %arg4: memref<1x128xf32, #tpu.memory_space<vmem>>, %arg5: memref<128x128xf32, #tpu.memory_space<vmem>>, %arg6: memref<1x128xf32, #tpu.memory_space<vmem>>, %arg7: memref<8x128xf32, #tpu.memory_space<vmem>>, %arg8: memref<8x128xf32, #tpu.memory_space<vmem>>) attributes {dimension_semantics = [#tpu.dimension_semantics<parallel>, #tpu.dimension_semantics<arbitrary>], iteration_bounds = array<i64: 1, 1>, scalar_prefetch = 0 : i64, scratch_operands = 1 : i64, tpu.core_type = #tpu.core_type<tc>, window_params = [{transform_indices = @transform_0, window_bounds = array<i64: 8, 32>}, {pipeline_mode = #tpu.pipeline_mode<synchronous>, transform_indices = @transform_1, window_bounds = array<i64: 32, 128>}, {pipeline_mode = #tpu.pipeline_mode<synchronous>, transform_indices = @transform_2, window_bounds = array<i64: 1, 128>}, {pipeline_mode = #tpu.pipeline_mode<synchronous>, transform_indices = @transform_3, window_bounds = array<i64: 128, 128>}, {pipeline_mode = #tpu.pipeline_mode<synchronous>, transform_indices = @transform_4, window_bounds = array<i64: 1, 128>}, {transform_indices = @transform_5, window_bounds = array<i64: 8, 128>}]} {
    %c0_i32 = arith.constant 0 : i32
    %0 = arith.cmpi eq, %arg1, %c0_i32 : i32
    %1 = arith.extui %0 : i1 to i32
    %c0_i32_0 = arith.constant 0 : i32
    %2 = arith.cmpi ne, %1, %c0_i32_0 : i32
    scf.if %2 {
      %cst_16 = arith.constant 0.000000e+00 : f32
      %19 = vector.broadcast %cst_16 : f32 to vector<8x128xf32>
      %c0_17 = arith.constant 0 : index
      %c0_18 = arith.constant 0 : index
      %20 = vector.load %arg8[%c0_17, %c0_18] : memref<8x128xf32, #tpu.memory_space<vmem>>, vector<8x128xf32>
      tpu.vector_store %arg8[%c0_17, %c0_18], %19 {strides = array<i32>} : memref<8x128xf32, #tpu.memory_space<vmem>>, vector<8x128xf32>,
    } else {
    }
    %c0 = arith.constant 0 : index
    %c0_1 = arith.constant 0 : index
    %3 = vector.load %arg2[%c0, %c0_1] : memref<8x32xf32, #tpu.memory_space<vmem>>, vector<8x32xf32>
    %c0_2 = arith.constant 0 : index
    %c0_3 = arith.constant 0 : index
    %4 = vector.load %arg3[%c0_2, %c0_3] : memref<32x128xf32, #tpu.memory_space<vmem>>, vector<32x128xf32>
    %cst = arith.constant dense<0.000000e+00> : vector<8x128xf32>
    %5 = tpu.matmul %3, %4, %cst {dimension_numbers = #tpu.dot_dimension_numbers<[1], [0], [0], [1], [0, 0, 1, 1], [], []>} : vector<8x32xf32>, vector<32x128xf32>, vector<8x128xf32> -> vector<8x128xf32>
    %c0_4 = arith.constant 0 : index
    %c0_5 = arith.constant 0 : index
    %6 = vector.load %arg4[%c0_4, %c0_5] : memref<1x128xf32, #tpu.memory_space<vmem>>, vector<1x128xf32>
    %7 = vector.broadcast %6 : vector<1x128xf32> to vector<8x128xf32>
    %8 = arith.addf %5, %7 : vector<8x128xf32>
    %cst_6 = arith.constant 0.000000e+00 : f32
    %9 = vector.broadcast %cst_6 : f32 to vector<8x128xf32>
    %10 = arith.maximumf %8, %9 : vector<8x128xf32>
    %c0_7 = arith.constant 0 : index
    %c0_8 = arith.constant 0 : index
    %11 = vector.load %arg8[%c0_7, %c0_8] : memref<8x128xf32, #tpu.memory_space<vmem>>, vector<8x128xf32>
    %c0_9 = arith.constant 0 : index
    %c0_10 = arith.constant 0 : index
    %12 = vector.load %arg5[%c0_9, %c0_10] : memref<128x128xf32, #tpu.memory_space<vmem>>, vector<128x128xf32>
    %cst_11 = arith.constant dense<0.000000e+00> : vector<8x128xf32>
    %13 = tpu.matmul %10, %12, %cst_11 {dimension_numbers = #tpu.dot_dimension_numbers<[1], [0], [0], [1], [0, 0, 1, 1], [], []>} : vector<8x128xf32>, vector<128x128xf32>, vector<8x128xf32> -> vector<8x128xf32>
    %14 = arith.addf %11, %13 : vector<8x128xf32>
    %c0_12 = arith.constant 0 : index
    %c0_13 = arith.constant 0 : index
    %15 = vector.load %arg8[%c0_12, %c0_13] : memref<8x128xf32, #tpu.memory_space<vmem>>, vector<8x128xf32>
    tpu.vector_store %arg8[%c0_12, %c0_13], %14 {strides = array<i32>} : memref<8x128xf32, #tpu.memory_space<vmem>>, vector<8x128xf32>,
    %c0_i32_14 = arith.constant 0 : i32
    %16 = arith.cmpi eq, %arg1, %c0_i32_14 : i32
    %17 = arith.extui %16 : i1 to i32
    %c0_i32_15 = arith.constant 0 : i32
    %18 = arith.cmpi ne, %17, %c0_i32_15 : i32
    scf.if %18 {
      %c0_16 = arith.constant 0 : index
      %c0_17 = arith.constant 0 : index
      %19 = vector.load %arg8[%c0_16, %c0_17] : memref<8x128xf32, #tpu.memory_space<vmem>>, vector<8x128xf32>
      %c0_18 = arith.constant 0 : index
      %c0_19 = arith.constant 0 : index
      %20 = vector.load %arg6[%c0_18, %c0_19] : memref<1x128xf32, #tpu.memory_space<vmem>>, vector<1x128xf32>
      %21 = vector.broadcast %20 : vector<1x128xf32> to vector<8x128xf32>
      %22 = arith.addf %19, %21 : vector<8x128xf32>
      %c0_20 = arith.constant 0 : index
      %c0_21 = arith.constant 0 : index
      %23 = vector.load %arg7[%c0_20, %c0_21] : memref<8x128xf32, #tpu.memory_space<vmem>>, vector<8x128xf32>
      tpu.vector_store %arg7[%c0_20, %c0_21], %22 {strides = array<i32>} : memref<8x128xf32, #tpu.memory_space<vmem>>, vector<8x128xf32>,
    } else {
    }
    return
  }
  func.func @transform_0(%arg0: i32, %arg1: i32) -> (i32, i32) {
    %c0_i32 = arith.constant 0 : i32
    %c0_i32_0 = arith.constant 0 : i32
    return %arg0, %c0_i32 : i32, i32
  }
  func.func @transform_1(%arg0: i32, %arg1: i32) -> (i32, i32) {
    %c0_i32 = arith.constant 0 : i32
    %c0_i32_0 = arith.constant 0 : i32
    return %c0_i32, %arg1 : i32, i32
  }
  func.func @transform_2(%arg0: i32, %arg1: i32) -> (i32, i32) {
    %c0_i32 = arith.constant 0 : i32
    %c0_i32_0 = arith.constant 0 : i32
    return %c0_i32, %arg1 : i32, i32
  }
  func.func @transform_3(%arg0: i32, %arg1: i32) -> (i32, i32) {
    %c0_i32 = arith.constant 0 : i32
    %c0_i32_0 = arith.constant 0 : i32
    return %arg1, %c0_i32 : i32, i32
  }
  func.func @transform_4(%arg0: i32, %arg1: i32) -> (i32, i32) {
    %c0_i32 = arith.constant 0 : i32
    %c0_i32_0 = arith.constant 0 : i32
    %c0_i32_1 = arith.constant 0 : i32
    return %c0_i32, %c0_i32_0 : i32, i32
  }
  func.func @transform_5(%arg0: i32, %arg1: i32) -> (i32, i32) {
    %c0_i32 = arith.constant 0 : i32
    %c0_i32_0 = arith.constant 0 : i32
    return %arg0, %c0_i32 : i32, i32
  }
}

</mosaic_0001>

<bundles_post_ra>
// kernel: tpu_custom_call.1
= control target key start
LH: loop header
LB: loop body
LE: loop exit
PB: predicated region body
PF: predicated region fallthrough
CT: control target
= control target key end

     0   :  { %10 = vsyncpa [#allocation4], 0  ;;  %s337_s0 = inlined_call_operand.hbm [shape: f32[8,32], index: 0, kind: input, shape index: {}]   ;;  %s338_s1 = inlined_call_operand.hbm [shape: f32[32,128], index: 1, kind: input, shape index: {}]   ;;  %s339_s2 = inlined_call_operand.vmem [shape: f32[1,128], index: 2, kind: input, shape index: {}]   ;;  %s340_s3 = inlined_call_operand.hbm [shape: f32[128,128], index: 3, kind: input, shape index: {}]   ;;  %s341_s4 = inlined_call_operand.vmem [shape: f32[1,128], index: 4, kind: input, shape index: {}]   ;;  %s342_s5 = inlined_call_operand.hbm [shape: f32[8,128], index: 5, kind: output, shape index: {}]  }
   0x1   :  { %11 = vsyncpa [#allocation7], 0  ;;  %s28_s20 = sshll.u32 %s338_s1, 4  ;;  %s29_s20 = int_to_ptr.hbm [resolvable:$true] %s28_s20 }
   0x2   :  { %12 = vsyncpa [#allocation5], 0  ;;  %s283_s21 = smov [#allocation6]   ;;  %s18_s25 = sshll.u32 %s337_s0, 4  ;;  %s19_s25 = int_to_ptr.hbm [resolvable:$true] %s18_s25 }
   0x3   :  { %s30_s22 = sshll.u32 %s283_s21, 4  ;;  %s284_s26 = smov 128   ;;  %s31_s22 = int_to_ptr.vmem [resolvable:$true] %s30_s22 }
   0x4   :  { %s285_s27 = smov 8   ;;  %s286_s28 = smov [#allocation3]  }
   0x5   :  { %36 = dma.hbm_to_vmem [thread:$0]  %s29_s20, 512, %s31_s22, [#allocation7], %s284_s26, %s284_s26, %s285_s27  }
   0x6   :  { %s20_s29 = sshll.u32 %s286_s28, 4  ;;  %s43_s7 = sshll.u32 %s340_s3, 4  ;;  %s21_s29 = int_to_ptr.vmem [resolvable:$true] %s20_s29  ;;  %s44_s7 = int_to_ptr.hbm [resolvable:$true] %s43_s7 }
   0x7   :  { %23 = dma.hbm_to_vmem [thread:$0]  %s19_s25, 128, %s21_s29, [#allocation4]  }
   0x8   :  { %s287_s1 = smov [#allocation8]  }
   0x9   :  { %s45_s8 = sshll.u32 %s287_s1, 4  ;;  %s46_s8 = int_to_ptr.vmem [resolvable:$true] %s45_s8 }
   0xa   :  { %51 = dma.hbm_to_vmem [thread:$0]  %s44_s7, 2048, %s46_s8, [#allocation7], %s284_s26, %s284_s26, %s285_s27  }
   0xb   :  { %277 = dma.done.wait [#allocation4], 128  }
   0xc   :  { %278 = vsyncadd [#allocation4], 4294967168 }
   0xd   :  { %279 = dma.done.wait [#allocation7], 2560  }
   0xe   :  { %280 = vsyncadd [#allocation7], 4294964736  ;;  %v75_v0 = vld [vmem:[#allocation6 + $0x18] sm:$0xff]  ;;  %v74_v1 = vld [vmem:[#allocation6 + $0x10] sm:$0xff]  ;;  %vm80_vm0 = vcmask 261120   ;;  %s288_s11 = smov [#allocation9]  }
   0xf   :  { %96 = vmatpush.msra.mxu0 %v75_v0  ;;  %v121_v2 = vld [vmem:[#allocation8 + $0x78] sm:$0xff]  ;;  %v73_v3 = vld [vmem:[#allocation6 + $0x8] sm:$0xff]  ;;  %v120_v4 = vld [vmem:[#allocation8 + $0x70] sm:$0xff]  ;;  %s159_s12 = sshll.u32 %s288_s11, 4  ;;  %s161_s15 = sshll.u32 %s342_s5, 4  ;;  %s160_s12 = int_to_ptr.vmem [resolvable:$true] %s159_s12  ;;  %s162_s15 = int_to_ptr.hbm [resolvable:$true] %s161_s15 }
  0x10   :  { %122 = vmatpush.msra.mxu1 %v121_v2  ;;  %v119_v5 = vld [vmem:[#allocation8 + $0x68] sm:$0xff]  ;;  %v72_v6 = vld [vmem:[#allocation6] sm:$0xff]  ;;  %v71_v7 = vld [vmem:[#allocation3] sm:$0xff] }
  0x11   :  { %97 = vmatpush.msra.mxu0 %v74_v1  ;;  %v118_v8 = vld [vmem:[#allocation8 + $0x60] sm:$0xff]  ;;  %v117_v9 = vld [vmem:[#allocation8 + $0x58] sm:$0xff]  ;;  %v116_v10 = vld [vmem:[#allocation8 + $0x50] sm:$0xff] }
  0x12   :  { %123 = vmatpush.msra.mxu1 %v120_v4  ;;  %v115_v11 = vld [vmem:[#allocation8 + $0x48] sm:$0xff]  ;;  %v114_v12 = vld [vmem:[#allocation8 + $0x40] sm:$0xff]  ;;  %v113_v13 = vld [vmem:[#allocation8 + $0x38] sm:$0xff] }
  0x13   :  { %98 = vmatpush.msra.mxu0 %v73_v3  ;;  %v112_v14 = vld [vmem:[#allocation8 + $0x30] sm:$0xff]  ;;  %v111_v15 = vld [vmem:[#allocation8 + $0x28] sm:$0xff]  ;;  %v110_v16 = vld [vmem:[#allocation8 + $0x20] sm:$0xff] }
  0x14   :  { %124 = vmatpush.msra.mxu1 %v119_v5  ;;  %v109_v17 = vld [vmem:[#allocation8 + $0x18] sm:$0xff]  ;;  %v108_v18 = vld [vmem:[#allocation8 + $0x10] sm:$0xff]  ;;  %v107_v19 = vld [vmem:[#allocation8 + $0x8] sm:$0xff] }
  0x15   :  { %99 = vmatpush.msra.mxu0 %v72_v6  ;;  %v106_v20 = vld [vmem:[#allocation8] sm:$0xff]  ;;  %v179_v21 = vld [vmem:[%s339_s2] ss:$0 sm:$0xff] }
  0x16   :  { %172 = vmatmul.msk.f32.vlgmr.msra.gmra.mxu0 %vm80_vm0, %v71_v7  ;;  %125 = vmatpush.msra.mxu1 %v118_v8  ;;  %v180_v25 = vld [vmem:[%s341_s4] ss:$0 sm:$0xff] }
  0x18   :  { %126 = vmatpush.msra.mxu1 %v117_v9 }
  0x1a   :  { %127 = vmatpush.msra.mxu1 %v116_v10 }
  0x1c   :  { %128 = vmatpush.msra.mxu1 %v115_v11 }
  0x1e   :  { %129 = vmatpush.msra.mxu1 %v114_v12 }
  0x20   :  { %130 = vmatpush.msra.mxu1 %v113_v13 }
  0x22   :  { %131 = vmatpush.msra.mxu1 %v112_v14 }
  0x24   :  { %132 = vmatpush.msra.mxu1 %v111_v15 }
  0x26   :  { %133 = vmatpush.msra.mxu1 %v110_v16 }
  0x28   :  { %134 = vmatpush.msra.mxu1 %v109_v17 }
  0x2a   :  { %135 = vmatpush.msra.mxu1 %v108_v18 }
  0x2c   :  { %136 = vmatpush.msra.mxu1 %v107_v19 }
  0x2e   :  { %137 = vmatpush.msra.mxu1 %v106_v20 }
  0x93   :  { %v101_v22 = vpop.f32.mrf.mxu0 }
  0x94   :  { %v102_v23 = vadd.f32 %v179_v21, %v101_v22 }
  0x96   :  { %v104_v24 = vmax.f32 %v102_v23, 0.0 }
  0x98   :  { %138 = vmatmul.f32.vlgmr.msra.gmra.mxu1 %v104_v24 }
 0x115   :  { %v139_v26 = vpop.f32.mrf.mxu1 }
 0x116   :  { %v152_v27 = vadd.f32 %v180_v25, %v139_v26 }
 0x118   :  { %153 = vst [vmem:[#allocation9] sm:$0xff] %v152_v27 }
 0x119   :  { %164 = dma.vmem_to_hbm [thread:$0]  %s160_s12, 128, %s162_s15, [#allocation5]  }
 0x11a   :  { %281 = dma.done.wait [#allocation5], 128  }
 0x11b   :  { %282 = vsyncadd [#allocation5], 4294967168 }
 0x11c   :  { %169 = vsyncpa [#allocation4], 1 }
 0x11d   :  { %170 = vsyncpa [#allocation7], 1 }
 0x11e   :  { %171 = vsyncpa [#allocation5], 1 }

</bundles_post_ra>
